<compile_context>
chip_gen: v5e
topology: v5e:2x2
jax: 0.10.0
libtpu: 0.0.40
codegen_flags: <defaults>
</compile_context>

<pallas_src>
import functools

import jax
import jax.numpy as jnp
from jax import lax
from jax.experimental import pallas as pl
from jax.experimental.pallas import tpu as pltpu


def _cdiv(a, b):
    return -(-a // b)


def _smooth_ce_kernel(pred_ref, tgt_ref, sum_ref, psum_ref, *,
                      eps, pad_idx, n_valid):
    i = pl.program_id(1)

    @pl.when(i == 0)
    def _():
        psum_ref[...] = jnp.zeros_like(psum_ref)

    raw = pred_ref[...]                                     # (tn, C) native dtype
    logits = raw.astype(jnp.float32)                        # cast in VMEM
    tgt = tgt_ref[...]                                      # (tn, 1) int32
    tn, n_class = logits.shape

    # numerically-stable logsumexp along the class (lane) dim, in f32
    m = jnp.max(logits, axis=1, keepdims=True)
    lse = m + jnp.log(jnp.sum(jnp.exp(logits - m), axis=1, keepdims=True))

    # target logit: (1, C) lane iota broadcast vs (tn, 1) targets; compare/select
    # in the native dtype (exact -- exactly one nonzero per row), then cast.
    col = lax.broadcasted_iota(jnp.int32, (1, n_class), 1)
    sel = jnp.where(col == tgt, raw, 0.0)
    logit_t = jnp.sum(sel, axis=1, keepdims=True).astype(jnp.float32)

    sum_logits = jnp.sum(logits, axis=1, keepdims=True)

    # collapsed smoothed NLL (no one_hot / log_prob materialization)
    w_t = 1.0 - eps - eps / (n_class - 1)
    w_o = eps / (n_class - 1)
    nll = -(w_t * (logit_t - lse) + w_o * (sum_logits - n_class * lse))  # (tn, 1)

    # Row-validity predicate for partial / overrun tail blocks + padding mask.
    # jnp.where (not multiply) so garbage rows can never propagate NaN/Inf.
    row0 = (pl.program_id(0) * pl.num_programs(1) + i) * tn
    rows = row0 + lax.broadcasted_iota(jnp.int32, (tn, 1), 0)
    keep = (rows < n_valid) & (tgt != pad_idx)
    psum_ref[...] += jnp.where(keep, nll, 0.0)

    @pl.when(i == pl.num_programs(1) - 1)
    def _():
        sum_ref[...] = jnp.sum(psum_ref[...]).reshape(1, 1, 1)


def _default_num_shards():
    # v7x has 2 TensorCores per chip that the leading "parallel" grid axis can be
    # sharded across; v5e / v6e are single-core and gain nothing from extra shards.
    try:
        kind = jax.devices()[0].device_kind.lower()
    except Exception:
        return 1
    return 2 if "v7" in kind else 1


def smooth_cross_entropy_loss(pred, tgt, *, tgt_pad_idx, eps=0.4,
                              reduction="mean", tile_rows=None, num_shards=None,
                              vmem_limit_bytes=48 * 1024 * 1024):
    assert reduction in ("mean", "sum"), "reduction should be mean or sum"
    B, T, C = pred.shape
    assert C >= 2, "label smoothing needs at least 2 classes (eps/(C-1))"
    N = B * T
    itemsize = jnp.dtype(pred.dtype).itemsize
    sub = max(8, 32 // itemsize)     # sublane multiple: f32 -> 8, bf16 -> 16, i8 -> 32

    if num_shards is None:
        num_shards = _default_num_shards()
    num_shards = max(1, int(num_shards))

    # --- tile sizing: as large as the VMEM budget allows (no fixed row cap) -----
    # Per-row VMEM footprint: 2x pred block (double-buffered) + 2x tgt block
    # (int32, lane-padded to 128 -> 512 B/row) + psum scratch (f32, 512 B/row).
    if tile_rows is None:
        budget = int(vmem_limit_bytes) * 3 // 4
        per_row = 2 * C * itemsize + 2 * 512 + 512
        tile_rows = max(sub, (budget // per_row) // sub * sub)
        per_shard_rows = _cdiv(_cdiv(N, num_shards), sub) * sub
        tile_rows = max(sub, min(tile_rows, per_shard_rows))
    else:
        tile_rows = max(sub, _cdiv(int(tile_rows), sub) * sub)

    pred2 = pred.reshape(N, C)                   # native dtype, no pad, no up-cast
    tgt2 = tgt.reshape(N, 1).astype(jnp.int32)

    tiles_total = _cdiv(N, tile_rows)
    num_shards = min(num_shards, tiles_total)
    tiles_per_shard = _cdiv(tiles_total, num_shards)

    def row_block(p, i):
        # Clamp so overrun blocks (partial tail / extra shard blocks) never issue
        # an out-of-bounds DMA; their rows are masked in-kernel via rows < N.
        return (jnp.minimum(p * tiles_per_shard + i, tiles_total - 1), 0)

    kernel = functools.partial(_smooth_ce_kernel, eps=float(eps),
                               pad_idx=int(tgt_pad_idx), n_valid=int(N))

    sums = pl.pallas_call(
        kernel,
        out_shape=jax.ShapeDtypeStruct((num_shards, 1, 1), jnp.float32),
        grid_spec=pltpu.PrefetchScalarGridSpec(
            num_scalar_prefetch=0,
            grid=(num_shards, tiles_per_shard),
            in_specs=[
                pl.BlockSpec((tile_rows, C), row_block),
                pl.BlockSpec((tile_rows, 1), row_block),
            ],
            out_specs=pl.BlockSpec((1, 1, 1), lambda p, i: (p, 0, 0)),
            scratch_shapes=[pltpu.VMEM((tile_rows, 1), jnp.float32)],
        ),
        compiler_params=pltpu.CompilerParams(
            dimension_semantics=("parallel", "arbitrary"),
            vmem_limit_bytes=int(vmem_limit_bytes)),
    )(pred2, tgt2)

    total = jnp.sum(sums)
    if reduction == "mean":
        # valid-token count on the tiny (B, T) targets; no kernel output needed
        count = jnp.sum((tgt.reshape(-1) != tgt_pad_idx).astype(jnp.float32))
        return total / count
    return total


def _reference(pred, tgt, *, tgt_pad_idx, eps=0.4, reduction="mean"):
    B, T, C = pred.shape
    p = pred.reshape(B * T, C).astype(jnp.float32)
    t = tgt.reshape(B * T)
    one_hot = jax.nn.one_hot(t, C, dtype=jnp.float32)
    one_hot_eps = one_hot * (1 - eps) + (1 - one_hot) * eps / (C - 1)
    log_prob = jax.nn.log_softmax(p, axis=1)
    nll = -(one_hot_eps * log_prob).sum(axis=1)
    mask = (t != tgt_pad_idx).astype(jnp.float32)
    if reduction == "mean":
        return jnp.sum(nll * mask) / jnp.sum(mask)
    return jnp.sum(nll * mask)


if __name__ == "__main__":
    key = jax.random.PRNGKey(0)
    k1, k2, k3, k4 = jax.random.split(key, 4)

    B, T, C = 2, 8, 32          # batch, seq, num classes
    tgt_pad_idx = 0
    eps = 0.4

    pred = jax.random.normal(k1, (B, T, C), dtype=jnp.float32)
    tgt = jax.random.randint(k2, (B, T), 0, C, dtype=jnp.int32)
    tgt = tgt.at[0, 0].set(tgt_pad_idx).at[1, 3].set(tgt_pad_idx)

    # mean reduction, f32 input
    loss = smooth_cross_entropy_loss(pred, tgt, tgt_pad_idx=tgt_pad_idx,
                                     eps=eps, reduction="mean")
    loss = jax.block_until_ready(loss)
    ref = _reference(pred, tgt, tgt_pad_idx=tgt_pad_idx, eps=eps, reduction="mean")
    assert jnp.allclose(loss, ref, rtol=1e-5, atol=1e-5), (loss, ref)

    # sum reduction
    loss_s = smooth_cross_entropy_loss(pred, tgt, tgt_pad_idx=tgt_pad_idx,
                                       eps=eps, reduction="sum")
    loss_s = jax.block_until_ready(loss_s)
    ref_s = _reference(pred, tgt, tgt_pad_idx=tgt_pad_idx, eps=eps, reduction="sum")
    assert jnp.allclose(loss_s, ref_s, rtol=1e-5, atol=1e-5), (loss_s, ref_s)

    # bf16 input streamed natively (cast to f32 per-tile inside the kernel)
    pred_bf16 = pred.astype(jnp.bfloat16)
    loss_b = smooth_cross_entropy_loss(pred_bf16, tgt, tgt_pad_idx=tgt_pad_idx,
                                       eps=eps, reduction="mean")
    loss_b = jax.block_until_ready(loss_b)
    ref_b = _reference(pred_bf16, tgt, tgt_pad_idx=tgt_pad_idx, eps=eps,
                       reduction="mean")
    assert jnp.allclose(loss_b, ref_b, rtol=1e-4, atol=1e-4), (loss_b, ref_b)

    # partial (non-divisible) tail block + forced 2-shard grid: exercises the
    # in-kernel row-validity masking path that replaced the wrapper jnp.pad
    B2, T2, C2 = 3, 5, 40
    pred_p = jax.random.normal(k3, (B2, T2, C2), dtype=jnp.float32)
    tgt_p = jax.random.randint(k4, (B2, T2), 0, C2, dtype=jnp.int32)
    tgt_p = tgt_p.at[0, 1].set(tgt_pad_idx)
    loss_p = smooth_cross_entropy_loss(pred_p, tgt_p, tgt_pad_idx=tgt_pad_idx,
                                       eps=eps, reduction="mean",
                                       tile_rows=8, num_shards=2)
    loss_p = jax.block_until_ready(loss_p)
    ref_p = _reference(pred_p, tgt_p, tgt_pad_idx=tgt_pad_idx, eps=eps,
                       reduction="mean")
    assert jnp.allclose(loss_p, ref_p, rtol=1e-5, atol=1e-5), (loss_p, ref_p)

    print("KERNEL_OK")
</pallas_src>

<mosaic_0001>
module attributes {stable_mosaic.version = 11 : i64} {
  func.func @_smooth_ce_kernel(%arg0: i32, %arg1: i32, %arg2: memref<16x32xf32, #tpu.memory_space<vmem>>, %arg3: memref<16x1xi32, #tpu.memory_space<vmem>>, %arg4: memref<1x1x1xf32, #tpu.memory_space<vmem>>, %arg5: memref<16x1xf32, #tpu.memory_space<vmem>>) attributes {dimension_semantics = [#tpu.dimension_semantics<parallel>, #tpu.dimension_semantics<arbitrary>], iteration_bounds = array<i64: 1, 1>, scalar_prefetch = 0 : i64, scratch_operands = 1 : i64, tpu.core_type = #tpu.core_type<tc>, window_params = [{transform_indices = @transform_0, window_bounds = array<i64: 16, 32>}, {transform_indices = @transform_1, window_bounds = array<i64: 16, 1>}, {transform_indices = @transform_2, window_bounds = array<i64: 1, 1, 1>}]} {
    %c0_i32 = arith.constant 0 : i32
    %0 = arith.cmpi eq, %arg1, %c0_i32 : i32
    %1 = arith.extui %0 : i1 to i32
    %c0_i32_0 = arith.constant 0 : i32
    %2 = arith.cmpi ne, %1, %c0_i32_0 : i32
    scf.if %2 {
      %cst_21 = arith.constant 0.000000e+00 : f32
      %54 = vector.broadcast %cst_21 : f32 to vector<16x1xf32>
      %c0_22 = arith.constant 0 : index
      %c0_23 = arith.constant 0 : index
      %55 = vector.load %arg5[%c0_22, %c0_23] : memref<16x1xf32, #tpu.memory_space<vmem>>, vector<16x1xf32>
      tpu.vector_store %arg5[%c0_22, %c0_23], %54 {strides = array<i32>} : memref<16x1xf32, #tpu.memory_space<vmem>>, vector<16x1xf32>,
    } else {
    }
    %c0 = arith.constant 0 : index
    %c0_1 = arith.constant 0 : index
    %3 = vector.load %arg2[%c0, %c0_1] : memref<16x32xf32, #tpu.memory_space<vmem>>, vector<16x32xf32>
    %c0_2 = arith.constant 0 : index
    %c0_3 = arith.constant 0 : index
    %4 = vector.load %arg3[%c0_2, %c0_3] : memref<16x1xi32, #tpu.memory_space<vmem>>, vector<16x1xi32>
    %cst = arith.constant dense<0xFF800000> : vector<16xf32>
    %5 = vector.multi_reduction <maximumf>, %3, %cst [1] : vector<16x32xf32> to vector<16xf32>
    %6 = vector.shape_cast %5 : vector<16xf32> to vector<16x1xf32>
    %7 = vector.broadcast %6 : vector<16x1xf32> to vector<16x32xf32>
    %8 = arith.subf %3, %7 : vector<16x32xf32>
    %9 = math.exp %8 : vector<16x32xf32>
    %cst_4 = arith.constant dense<0.000000e+00> : vector<16xf32>
    %10 = vector.multi_reduction <add>, %9, %cst_4 [1] : vector<16x32xf32> to vector<16xf32>
    %11 = vector.shape_cast %10 : vector<16xf32> to vector<16x1xf32>
    %12 = math.log %11 : vector<16x1xf32>
    %13 = arith.addf %6, %12 : vector<16x1xf32>
    %14 = tpu.iota {dimensions = array<i32: 1>} : vector<1x32xi32>
    %15 = vector.broadcast %14 : vector<1x32xi32> to vector<16x32xi32>
    %16 = vector.broadcast %4 : vector<16x1xi32> to vector<16x32xi32>
    %17 = arith.cmpi eq, %15, %16 : vector<16x32xi32>
    %cst_5 = arith.constant 0.000000e+00 : f32
    %18 = vector.broadcast %cst_5 : f32 to vector<16x32xf32>
    %19 = arith.select %17, %3, %18 : vector<16x32xi1>, vector<16x32xf32>
    %cst_6 = arith.constant dense<0.000000e+00> : vector<16xf32>
    %20 = vector.multi_reduction <add>, %19, %cst_6 [1] : vector<16x32xf32> to vector<16xf32>
    %21 = vector.shape_cast %20 : vector<16xf32> to vector<16x1xf32>
    %cst_7 = arith.constant dense<0.000000e+00> : vector<16xf32>
    %22 = vector.multi_reduction <add>, %3, %cst_7 [1] : vector<16x32xf32> to vector<16xf32>
    %23 = vector.shape_cast %22 : vector<16xf32> to vector<16x1xf32>
    %24 = arith.subf %21, %13 : vector<16x1xf32>
    %cst_8 = arith.constant 0.587096751 : f32
    %25 = vector.broadcast %cst_8 : f32 to vector<16x1xf32>
    %26 = arith.mulf %25, %24 : vector<16x1xf32>
    %cst_9 = arith.constant 3.200000e+01 : f32
    %27 = vector.broadcast %cst_9 : f32 to vector<16x1xf32>
    %28 = arith.mulf %27, %13 : vector<16x1xf32>
    %29 = arith.subf %23, %28 : vector<16x1xf32>
    %cst_10 = arith.constant 0.0129032256 : f32
    %30 = vector.broadcast %cst_10 : f32 to vector<16x1xf32>
    %31 = arith.mulf %30, %29 : vector<16x1xf32>
    %32 = arith.addf %26, %31 : vector<16x1xf32>
    %cst_11 = arith.constant 0.000000e+00 : f32
    %33 = vector.broadcast %cst_11 : f32 to vector<16x1xf32>
    %34 = arith.subf %33, %32 : vector<16x1xf32>
    %c1_i32 = arith.constant 1 : i32
    %35 = arith.muli %arg0, %c1_i32 : i32
    %36 = arith.addi %35, %arg1 : i32
    %c16_i32 = arith.constant 16 : i32
    %37 = arith.muli %36, %c16_i32 : i32
    %38 = tpu.iota {dimensions = array<i32: 0>} : vector<16x1xi32>
    %39 = vector.broadcast %37 : i32 to vector<16x1xi32>
    %40 = arith.addi %39, %38 : vector<16x1xi32>
    %c16_i32_12 = arith.constant 16 : i32
    %41 = vector.broadcast %c16_i32_12 : i32 to vector<16x1xi32>
    %42 = arith.cmpi slt, %40, %41 : vector<16x1xi32>
    %c0_i32_13 = arith.constant 0 : i32
    %43 = vector.broadcast %c0_i32_13 : i32 to vector<16x1xi32>
    %44 = arith.cmpi ne, %4, %43 : vector<16x1xi32>
    %45 = arith.andi %42, %44 : vector<16x1xi1>
    %c0_14 = arith.constant 0 : index
    %c0_15 = arith.constant 0 : index
    %46 = vector.load %arg5[%c0_14, %c0_15] : memref<16x1xf32, #tpu.memory_space<vmem>>, vector<16x1xf32>
    %cst_16 = arith.constant 0.000000e+00 : f32
    %47 = vector.broadcast %cst_16 : f32 to vector<16x1xf32>
    %48 = arith.select %45, %34, %47 : vector<16x1xi1>, vector<16x1xf32>
    %49 = arith.addf %46, %48 : vector<16x1xf32>
    %c0_17 = arith.constant 0 : index
    %c0_18 = arith.constant 0 : index
    %50 = vector.load %arg5[%c0_17, %c0_18] : memref<16x1xf32, #tpu.memory_space<vmem>>, vector<16x1xf32>
    tpu.vector_store %arg5[%c0_17, %c0_18], %49 {strides = array<i32>} : memref<16x1xf32, #tpu.memory_space<vmem>>, vector<16x1xf32>,
    %c0_i32_19 = arith.constant 0 : i32
    %51 = arith.cmpi eq, %arg1, %c0_i32_19 : i32
    %52 = arith.extui %51 : i1 to i32
    %c0_i32_20 = arith.constant 0 : i32
    %53 = arith.cmpi ne, %52, %c0_i32_20 : i32
    scf.if %53 {
      %c0_21 = arith.constant 0 : index
      %c0_22 = arith.constant 0 : index
      %54 = vector.load %arg5[%c0_21, %c0_22] : memref<16x1xf32, #tpu.memory_space<vmem>>, vector<16x1xf32>
      %55 = vector.shape_cast %54 : vector<16x1xf32> to vector<1x16x1xf32>
      %cst_23 = arith.constant dense<0.000000e+00> : vector<1xf32>
      %56 = vector.multi_reduction <add>, %55, %cst_23 [1, 2] : vector<1x16x1xf32> to vector<1xf32>
      %57 = vector.shape_cast %56 : vector<1xf32> to vector<1x1x1xf32>
      %58 = vector.extract %57[0, 0, 0] : f32 from vector<1x1x1xf32>
      %59 = vector.broadcast %58 : f32 to vector<1x1x1xf32>
      %c0_24 = arith.constant 0 : index
      %c0_25 = arith.constant 0 : index
      %c0_26 = arith.constant 0 : index
      %60 = vector.load %arg4[%c0_24, %c0_25, %c0_26] : memref<1x1x1xf32, #tpu.memory_space<vmem>>, vector<1x1x1xf32>
      tpu.vector_store %arg4[%c0_24, %c0_25, %c0_26], %59 {strides = array<i32>} : memref<1x1x1xf32, #tpu.memory_space<vmem>>, vector<1x1x1xf32>,
    } else {
    }
    return
  }
  func.func @transform_0(%arg0: i32, %arg1: i32) -> (i32, i32) {
    %c1_i32 = arith.constant 1 : i32
    %0 = arith.muli %arg0, %c1_i32 : i32
    %1 = arith.addi %0, %arg1 : i32
    %c0_i32 = arith.constant 0 : i32
    %2 = arith.minsi %1, %c0_i32 : i32
    %c0_i32_0 = arith.constant 0 : i32
    %c0_i32_1 = arith.constant 0 : i32
    return %2, %c0_i32_0 : i32, i32
  }
  func.func @transform_1(%arg0: i32, %arg1: i32) -> (i32, i32) {
    %c1_i32 = arith.constant 1 : i32
    %0 = arith.muli %arg0, %c1_i32 : i32
    %1 = arith.addi %0, %arg1 : i32
    %c0_i32 = arith.constant 0 : i32
    %2 = arith.minsi %1, %c0_i32 : i32
    %c0_i32_0 = arith.constant 0 : i32
    %c0_i32_1 = arith.constant 0 : i32
    return %2, %c0_i32_0 : i32, i32
  }
  func.func @transform_2(%arg0: i32, %arg1: i32) -> (i32, i32, i32) {
    %c0_i32 = arith.constant 0 : i32
    %c0_i32_0 = arith.constant 0 : i32
    %c0_i32_1 = arith.constant 0 : i32
    return %arg0, %c0_i32, %c0_i32_0 : i32, i32, i32
  }
}

</mosaic_0001>

<bundles_post_ra>
// kernel: tpu_custom_call.1
= control target key start
LH: loop header
LB: loop body
LE: loop exit
PB: predicated region body
PF: predicated region fallthrough
CT: control target
= control target key end

     0   :  { %vm87_vm0 = vcmask 261120   ;;  %v262_v3 = vmov 0   ;;  %s317_s0 = inlined_call_operand.vmem [shape: f32[16,32], index: 0, kind: input, shape index: {}]   ;;  %s318_s1 = inlined_call_operand.vmem [shape: s32[16,1], index: 1, kind: input, shape index: {}]   ;;  %s319_s2 = inlined_call_operand.hbm [shape: f32[1,1,1], index: 2, kind: output, shape index: {}]  }
   0x1   :  { %v83_v0 = vld [vmem:[%s317_s0] sm:$0xff]  ;;  %226 = vset.pattern.permute.xlu1 %v262_v3  ;;  %227 = vset.pattern.permute.xlu0 %v262_v3 }
   0x2   :  { %v286_v1 = vld [vmem:[%s318_s1] sm:$0xff]  ;;  %v88_v2 = vsel %vm87_vm0, %v83_v0, -inf }
   0x3   :  { %7 = vsyncpa [#allocation4], 0  ;;  %89 = vmax.xlane.f32.xlu0 %v88_v2  ;;  %115 = vperm.xlu1 %226, %v286_v1   ;;  %v84_v4 = vld [vmem:[%s317_s0 + $0x8] sm:$0xff]  ;;  %v112_v7 = vlaneseq  ;;  %v130_v26 = vsel %vm87_vm0, %v83_v0, 0.0  ;;  %vm80_vm3 = vcmask 7168   ;;  %v263_v27 = vmov 0.0  }
   0x4   :  { %v91_v5 = vsel %vm87_vm0, %v84_v4, -inf  ;;  %v297_v6 = vld [vmem:[%s318_s1 + $0x8] sm:$0xff]  ;;  %v133_v17 = vsel %vm87_vm0, %v84_v4, 0.0  ;;  %81 = vst.msk [vmem:[#allocation2] sm:$0xff] %vm80_vm3, %v263_v27  ;;  %vm160_vm4 = vcmp.ne.s32.totalorder %v286_v1, 0  ;;  %s264_s0 = smov [#allocation3]  }
   0x5   :  { %v113_v8 = vand.u32 127, %v112_v7  ;;  %82 = vst.msk [vmem:[#allocation2 + $0x8] sm:$0xff] %vm80_vm3, %v263_v27  ;;  %vm161_vm5 = vcmp.ne.s32.totalorder %v297_v6, 0  ;;  %s198_s1 = sshll.u32 %s264_s0, 4  ;;  %s200_s19 = sshll.u32 %s319_s2, 4  ;;  %vm191_vm6 = vcmask 0   ;;  %s199_s1 = int_to_ptr.vmem [resolvable:$true] %s198_s1  ;;  %s201_s19 = int_to_ptr.hbm [resolvable:$true] %s200_s19 }
   0xb   :  { %92 = vmax.xlane.f32.xlu0 %v91_v5  ;;  %118 = vperm.xlu1 %226, %v297_v6   ;;  %v164_v50 = vld [vmem:[#allocation2] sm:$0xff] }
   0xc   :  { %v165_v57 = vld [vmem:[#allocation2 + $0x8] sm:$0xff] }
  0x75   :  { %v116_v9 = vpop.permute.xlu1 %115 }
  0x76   :  { %v90_v10 = vpop.xlane.xlu0 %89  ;;  %vm120_vm1 = vcmp.eq.s32.totalorder %v113_v8, %v116_v9 }
  0x77   :  { %v94_v11 = vsub.f32 %v83_v0, %v90_v10  ;;  %v122_v12 = vsel %vm120_vm1, %v83_v0, 0.0 }
  0x78   :  { %v124_v13 = vsel %vm87_vm0, %v122_v12, 0.0 }
  0x79   :  { %v96_v14 = vmul.f32 1.442695, %v94_v11  ;;  %125 = vadd.xlane.f32.xlu0 %v124_v13 }
  0x7b   :  { %228 = vpow2.f32 %v96_v14 }
  0x7d   :  { %v119_v15 = vpop.permute.xlu1 %118 }
  0x7e   :  { %v93_v16 = vpop.xlane.xlu0 %92  ;;  %vm121_vm2 = vcmp.eq.s32.totalorder %v113_v8, %v119_v15 }
  0x7f   :  { %v95_v18 = vsub.f32 %v84_v4, %v93_v16  ;;  %v123_v19 = vsel %vm121_vm2, %v84_v4, 0.0 }
  0x80   :  { %v127_v20 = vsel %vm87_vm0, %v123_v19, 0.0 }
  0x81   :  { %v229_v21 = vpop.eup %228  ;;  %v98_v22 = vmul.f32 1.442695, %v95_v18  ;;  %128 = vadd.xlane.f32.xlu1 %v127_v20  ;;  %134 = vadd.xlane.f32.xlu0 %v133_v17 }
  0x82   :  { %v100_v23 = vsel %vm87_vm0, %v229_v21, 0.0 }
  0x83   :  { %230 = vpow2.f32 %v98_v22  ;;  %101 = vadd.xlane.f32.xlu2 %v100_v23 }
  0x89   :  { %v231_v24 = vpop.eup %230 }
  0x8a   :  { %v103_v25 = vsel %vm87_vm0, %v231_v24, 0.0 }
  0x8b   :  { %104 = vadd.xlane.f32.xlu2 %v103_v25 }
  0x93   :  { %131 = vadd.xlane.f32.xlu2 %v130_v26 }
  0xec   :  { %v126_v33 = vpop.xlane.xlu0 %125 }
  0xf4   :  { %v129_v42 = vpop.xlane.xlu1 %128  ;;  %v135_v44 = vpop.xlane.xlu0 %134 }
  0xf6   :  { %v102_v28 = vpop.xlane.xlu2 %101 }
  0xf7   :  { %232 = vlog2.f32 %v102_v28 }
  0xfd   :  { %v233_v29 = vpop.eup %232 }
  0xfe   :  { %v107_v30 = vmul.f32 0.6931472, %v233_v29  ;;  %v105_v31 = vpop.xlane.xlu2 %104 }
  0xff   :  { %234 = vlog2.f32 %v105_v31 }
 0x100   :  { %v110_v32 = vadd.f32 %v107_v30, %v90_v10 }
 0x102   :  { %v136_v35 = vsub.f32 %v126_v33, %v110_v32  ;;  %v140_v36 = vmul.f32 32.0, %v110_v32 }
 0x104   :  { %v138_v41 = vmul.f32 0.58709675, %v136_v35 }
 0x105   :  { %v235_v34 = vpop.eup %234 }
 0x106   :  { %v109_v37 = vmul.f32 0.6931472, %v235_v34  ;;  %v132_v38 = vpop.xlane.xlu2 %131 }
 0x107   :  { %v142_v39 = vsub.f32 %v132_v38, %v140_v36 }
 0x108   :  { %v111_v40 = vadd.f32 %v109_v37, %v93_v16 }
 0x109   :  { %v144_v43 = vmul.f32 0.012903226, %v142_v39 }
 0x10a   :  { %v137_v45 = vsub.f32 %v129_v42, %v111_v40  ;;  %v141_v46 = vmul.f32 32.0, %v111_v40 }
 0x10b   :  { %v146_v47 = vadd.f32 %v144_v43, %v138_v41 }
 0x10c   :  { %v143_v48 = vsub.f32 %v135_v44, %v141_v46  ;;  %v139_v51 = vmul.f32 0.58709675, %v137_v45 }
 0x10d   :  { %v148_v49 = vsub.f32 0.0, %v146_v47 }
 0x10e   :  { %v145_v52 = vmul.f32 0.012903226, %v143_v48 }
 0x10f   :  { %v166_v53 = vsel %vm160_vm4, %v148_v49, 0.0 }
 0x110   :  { %v168_v54 = vadd.f32 %v166_v53, %v164_v50  ;;  %v147_v55 = vadd.f32 %v145_v52, %v139_v51 }
 0x112   :  { %171 = vst.msk [vmem:[#allocation2] sm:$0xff] %vm80_vm3, %v168_v54  ;;  %v149_v56 = vsub.f32 0.0, %v147_v55 }
 0x114   :  { %v167_v58 = vsel %vm161_vm5, %v149_v56, 0.0 }
 0x115   :  { %v169_v59 = vadd.f32 %v167_v58, %v165_v57 }
 0x117   :  { %172 = vst.msk [vmem:[#allocation2 + $0x8] sm:$0xff] %vm80_vm3, %v169_v59 }
 0x119   :  { %v176_v60 = vld [vmem:[#allocation2] sm:$0xff] }
 0x11a   :  { %v178_v62 = vsel %vm80_vm3, %v176_v60, 0.0 }
 0x11e   :  { %v177_v61 = vld [vmem:[#allocation2 + $0x8] sm:$0xff] }
 0x11f   :  { %v179_v63 = vsel %vm80_vm3, %v177_v61, 0.0 }
 0x120   :  { %v180_v0 = vadd.f32 %v179_v63, %v178_v62 }
 0x122   :  { %181 = vadd.xlane.f32.xlu2 %v180_v0 }
 0x195   :  { %v182_v1 = vpop.xlane.xlu2 %181 }
 0x196   :  { %v183_v2 = vrot.slane %v182_v1, 4 }
 0x198   :  { %v184_v3 = vadd.f32 %v183_v2, %v182_v1 }
 0x19a   :  { %v185_v4 = vrot.slane %v184_v3, 2 }
 0x19c   :  { %v186_v5 = vadd.f32 %v185_v4, %v184_v3 }
 0x19e   :  { %v187_v6 = vrot.slane %v186_v5, 1 }
 0x1a0   :  { %v188_v7 = vadd.f32 %v187_v6, %v186_v5 }
 0x1a2   :  { %221 = vpush %v188_v7 }
 0x1d3   :  { %s222_s20 = spop %221 }
 0x1d4   :  { %v190_v8 = vstv %s222_s20 }
 0x1d5   :  { %192 = vst.msk [vmem:[#allocation3] sm:$0x1] %vm191_vm6, %v190_v8 }
 0x1d6   :  { %203 = dma.vmem_to_hbm [thread:$0]  %s199_s1, 16, %s201_s19, [#allocation4]  }
 0x1d7   :  { %260 = dma.done.wait [#allocation4], 16  }
 0x1d8   :  { %261 = vsyncadd [#allocation4], 4294967280 }
 0x1d9   :  { %208 = vsyncpa [#allocation4], 1 }

</bundles_post_ra>
